<compile_context>
chip_gen: v7x
topology: tpu7x:2x2x1
jax: 0.10.0
libtpu: 0.0.40
codegen_flags: <defaults>
</compile_context>

<pallas_src>
import functools
import math

import jax
import jax.numpy as jnp
import numpy as np
from jax import lax
from jax.experimental import pallas as pl
from jax.experimental.pallas import tpu as pltpu

_LANE = 128
_SLAB_BYTES = 2 * 1024 * 1024   # f32 working-slab cap inside the reduction loop

# Padded-map offsets for the conv kernel (all >= max padding 3).
_ROW_OFF = 8     # sublane-aligned top pad (== bottom pad)
_COL_OFF = 8     # small left pad (review #7: was 128)
_RIGHT_PAD = 8


def _device_budgets():
    """(input-block byte budget, vmem_limit_bytes) sized per TPU generation."""
    kind = ""
    try:
        kind = jax.devices()[0].device_kind.lower()
    except Exception:
        pass
    if "v7" in kind:
        # v7x: 64 MiB physical VMEM per TensorCore -> smaller blocks, <=48 MiB limit.
        return 12 * 1024 * 1024, 48 * 1024 * 1024
    # v5e / v6e (128 MiB physical VMEM) and default.
    return 24 * 1024 * 1024, 96 * 1024 * 1024


def _sublane_multiple(itemsize):
    """Sublane tiling multiple for the input dtype."""
    return {4: 8, 2: 16, 1: 32}.get(itemsize, 8)


def _plan_reduce_tiles(C, HW, itemsize, budget_bytes):
    """Pick (CC channels, THW lanes, SUB slab rows) for the (C, H*W) slab."""
    sub = _sublane_multiple(itemsize)
    # Cap the lane tile so one (sub, THW) f32 working slab stays ~2 MiB.
    thw_cap = max(_LANE, (_SLAB_BYTES // (sub * 4)) // _LANE * _LANE)
    thw = min(HW, thw_cap)
    # Make sure at least min(C, sub) channel rows fit at this spatial tile.
    min_rows = min(C, sub)
    max_thw = budget_bytes // max(1, min_rows * itemsize)
    if thw > max_thw:
        thw = max(_LANE, (max_thw // _LANE) * _LANE)
    thw = min(thw, HW)
    rows_budget = budget_bytes // max(1, thw * itemsize)
    if rows_budget >= C or C <= sub:
        cc = C                      # whole channel extent (legal as a full dim)
    else:
        cc = max(sub, (rows_budget // sub) * sub)   # multiple of the sublane tile
    return int(cc), int(thw), int(sub)


def _reduce_kernel(x_ref, avg_ref, max_ref, *, C, CC, SUB, n_c, last_valid, unroll):
    """Running channel sum/max over (CC, THW) blocks, accumulated in the
    revisited output blocks; avg finalized (scaled by 1/C) on the last chunk."""
    c_idx = pl.program_id(2)

    @pl.when(c_idx == 0)
    def _init():
        avg_ref[...] = jnp.zeros(avg_ref.shape, jnp.float32)
        max_ref[...] = jnp.full(max_ref.shape, -jnp.inf, jnp.float32)

    def reduce_block(valid):
        # `valid` is a static Python int -> no masking anywhere.
        n_full = valid // SUB
        rem = valid % SUB
        s = avg_ref[...]
        m = max_ref[...]
        if n_full > 0:
            def body(i, carry):
                s, m = carry
                start = pl.multiple_of(i * SUB, SUB)
                blk = x_ref[pl.ds(start, SUB), :].astype(jnp.float32)
                s = s + jnp.sum(blk, axis=0, keepdims=True)
                m = jnp.maximum(m, jnp.max(blk, axis=0, keepdims=True))
                return s, m
            s, m = lax.fori_loop(0, n_full, body, (s, m), unroll=unroll)
        if rem > 0:
            base = n_full * SUB
            blk = x_ref[base:base + rem, :].astype(jnp.float32)
            s = s + jnp.sum(blk, axis=0, keepdims=True)
            m = jnp.maximum(m, jnp.max(blk, axis=0, keepdims=True))
        avg_ref[...] = s
        max_ref[...] = m

    if n_c == 1:
        reduce_block(C)
    elif last_valid == CC:
        reduce_block(CC)
    else:
        @pl.when(c_idx < n_c - 1)
        def _full():
            reduce_block(CC)

        @pl.when(c_idx == n_c - 1)
        def _tail():
            reduce_block(last_valid)

    @pl.when(c_idx == n_c - 1)
    def _finalize():
        avg_ref[...] = avg_ref[...] * jnp.float32(1.0 / C)


def _conv_sigmoid_kernel(avg_ref, max_ref, w_ref, o_ref, pavg_ref, pmax_ref,
                         *, H, W, K, P):
    """Per-batch KxK 2->1 conv (zero padded) + sigmoid on the reduced maps."""
    # Borders of the padded scratch maps are zeroed once; the interior is fully
    # overwritten every batch and scratch persists across grid steps.  This
    # requires the (single) grid axis to stay sequential ("arbitrary").
    @pl.when(pl.program_id(0) == 0)
    def _zero_borders():
        pavg_ref[...] = jnp.zeros(pavg_ref.shape, jnp.float32)
        pmax_ref[...] = jnp.zeros(pmax_ref.shape, jnp.float32)

    pavg_ref[_ROW_OFF:_ROW_OFF + H, _COL_OFF:_COL_OFF + W] = avg_ref[...]
    pmax_ref[_ROW_OFF:_ROW_OFF + H, _COL_OFF:_COL_OFF + W] = max_ref[...]

    pavg = pavg_ref[...]
    pmax = pmax_ref[...]
    r0 = _ROW_OFF - P
    c0 = _COL_OFF - P

    # Hoisted lane-direction (kw) shifts: 2*K lane relayouts total.
    avg_cols = [pavg[:, c0 + kw:c0 + kw + W] for kw in range(K)]
    max_cols = [pmax[:, c0 + kw:c0 + kw + W] for kw in range(K)]

    # Row (kh) accumulation restructured so only K sublane relayouts are
    # needed (review #9): sum the kw taps at full padded height, then take a
    # single row-shifted slice per kh.
    acc = jnp.zeros((H, W), jnp.float32)
    for kh in range(K):
        ra0 = jnp.zeros_like(avg_cols[0])
        ra1 = jnp.zeros_like(avg_cols[0])
        for kw in range(K):
            tap = (w_ref[kh * K + kw] * avg_cols[kw]
                   + w_ref[K * K + kh * K + kw] * max_cols[kw])
            if kw % 2 == 0:
                ra0 = ra0 + tap
            else:
                ra1 = ra1 + tap
        ra = ra0 + ra1
        acc = acc + ra[r0 + kh:r0 + kh + H, :]
    o_ref[...] = jax.nn.sigmoid(acc)[None, :, :].astype(o_ref.dtype)


def spatial_attention(x, conv_weight, kernel_size=7, *,
                      block_budget_bytes=None, vmem_limit_bytes=None):
    """x: (N, C, H, W) float; conv_weight: (1, 2, K, K) f32 -> (N, 1, H, W)."""
    assert kernel_size in (3, 7), "kernel size must be 3 or 7"
    N, C, H, W = x.shape
    K = kernel_size
    P = 3 if K == 7 else 1
    HW = H * W
    itemsize = jnp.dtype(x.dtype).itemsize

    default_budget, default_limit = _device_budgets()
    budget = block_budget_bytes or default_budget
    vmem_limit = vmem_limit_bytes or default_limit

    CC, THW, SUB = _plan_reduce_tiles(C, HW, itemsize, budget)
    n_c = pl.cdiv(C, CC)
    n_s = pl.cdiv(HW, THW)
    last_valid = C - (n_c - 1) * CC

    lane_tiles = pl.cdiv(THW, _LANE)
    if lane_tiles <= 8:
        unroll = 8
    elif lane_tiles <= 32:
        unroll = 4
    elif lane_tiles <= 128:
        unroll = 2
    else:
        unroll = 1

    # Lane-dense view: flattened spatial extent in the lane dimension.
    x2 = x.reshape(N, C, HW)

    reduce_fn = functools.partial(
        _reduce_kernel, C=C, CC=CC, SUB=SUB, n_c=n_c,
        last_valid=last_valid, unroll=unroll)
    avg_map, max_map = pl.pallas_call(
        reduce_fn,
        out_shape=(jax.ShapeDtypeStruct((N, 1, HW), jnp.float32),
                   jax.ShapeDtypeStruct((N, 1, HW), jnp.float32)),
        grid=(N, n_s, n_c),
        in_specs=[pl.BlockSpec((None, CC, THW), lambda n, s, c: (n, c, s))],
        out_specs=(pl.BlockSpec((None, 1, THW), lambda n, s, c: (n, 0, s)),
                   pl.BlockSpec((None, 1, THW), lambda n, s, c: (n, 0, s))),
        compiler_params=pltpu.CompilerParams(
            # Accumulation lives in the revisited output blocks, so batch and
            # spatial tiles are safe to run in parallel (v7x dual TensorCore);
            # only the channel-chunk (reduction) axis must stay "arbitrary".
            dimension_semantics=("parallel", "parallel", "arbitrary"),
            vmem_limit_bytes=vmem_limit),
    )(x2)

    avg_2d = avg_map.reshape(N, H, W)
    max_2d = max_map.reshape(N, H, W)
    w_flat = conv_weight.reshape(-1).astype(jnp.float32)

    pad_rows = H + 2 * _ROW_OFF
    pad_cols = W + _COL_OFF + _RIGHT_PAD
    conv_fn = functools.partial(_conv_sigmoid_kernel, H=H, W=W, K=K, P=P)
    out = pl.pallas_call(
        conv_fn,
        out_shape=jax.ShapeDtypeStruct((N, 1, H, W), x.dtype),
        grid=(N,),
        in_specs=[pl.BlockSpec((None, H, W), lambda n: (n, 0, 0)),
                  pl.BlockSpec((None, H, W), lambda n: (n, 0, 0)),
                  pl.BlockSpec(memory_space=pltpu.MemorySpace.SMEM)],
        out_specs=pl.BlockSpec((None, 1, H, W), lambda n: (n, 0, 0, 0)),
        scratch_shapes=[pltpu.VMEM((pad_rows, pad_cols), jnp.float32),
                        pltpu.VMEM((pad_rows, pad_cols), jnp.float32)],
        compiler_params=pltpu.CompilerParams(
            # Must stay sequential: padded-map borders are zeroed only once.
            dimension_semantics=("arbitrary",),
            vmem_limit_bytes=vmem_limit),
    )(avg_2d, max_2d, w_flat)
    return out


def spatial_attention_ref(x, conv_weight, kernel_size=7):
    """Pure-JAX reference matching the PyTorch forward."""
    avg = jnp.mean(x.astype(jnp.float32), axis=1, keepdims=True)
    mx = jnp.max(x, axis=1, keepdims=True).astype(jnp.float32)
    cat = jnp.concatenate([avg, mx], axis=1)
    P = 3 if kernel_size == 7 else 1
    y = lax.conv_general_dilated(
        cat, conv_weight.astype(jnp.float32), window_strides=(1, 1),
        padding=((P, P), (P, P)),
        dimension_numbers=("NCHW", "OIHW", "NCHW"))
    return jax.nn.sigmoid(y).astype(x.dtype)


if __name__ == "__main__":
    key = jax.random.PRNGKey(0)
    kx, kw_, kx2 = jax.random.split(key, 3)

    K = 7
    # Deterministic conv weight (Conv2d(2, 1, 7, bias=False) kaiming-uniform-like).
    bound = 1.0 / math.sqrt(2 * K * K)
    conv_weight = jax.random.uniform(
        kw_, (1, 2, K, K), dtype=jnp.float32, minval=-bound, maxval=bound)

    # Test 1: canonical small shape (single-block fast path).
    N, C, H, W = 2, 4, 16, 16
    x = jax.random.normal(kx, (N, C, H, W), dtype=jnp.float32)
    out = jax.block_until_ready(spatial_attention(x, conv_weight, K))
    ref = jax.block_until_ready(spatial_attention_ref(x, conv_weight, K))
    assert out.shape == (N, 1, H, W), out.shape
    np.testing.assert_allclose(np.asarray(out), np.asarray(ref),
                               rtol=1e-4, atol=1e-4)

    # Test 2: non-divisor channel count with a tiny budget to force channel
    # chunking, the static tail slice, and spatial (lane) tiling.
    N2, C2, H2, W2 = 1, 20, 8, 24
    x2 = jax.random.normal(kx2, (N2, C2, H2, W2), dtype=jnp.float32)
    out2 = jax.block_until_ready(
        spatial_attention(x2, conv_weight, K, block_budget_bytes=4096))
    ref2 = jax.block_until_ready(spatial_attention_ref(x2, conv_weight, K))
    np.testing.assert_allclose(np.asarray(out2), np.asarray(ref2),
                               rtol=1e-4, atol=1e-4)

    print("KERNEL_OK")
</pallas_src>

<mosaic_0001>
module attributes {stable_mosaic.version = 11 : i64} {
  func.func @_reduce_kernel(%arg0: i32, %arg1: i32, %arg2: i32, %arg3: memref<1x4x256xf32, #tpu.memory_space<vmem>>, %arg4: memref<1x1x256xf32, #tpu.memory_space<vmem>>, %arg5: memref<1x1x256xf32, #tpu.memory_space<vmem>>) attributes {dimension_semantics = [#tpu.dimension_semantics<parallel>, #tpu.dimension_semantics<parallel>, #tpu.dimension_semantics<arbitrary>], iteration_bounds = array<i64: 2, 1, 1>, scalar_prefetch = 0 : i64, scratch_operands = 0 : i64, tpu.core_type = #tpu.core_type<tc>, window_params = [{transform_indices = @transform_0, window_bounds = array<i64: 1, 4, 256>}, {transform_indices = @transform_1, window_bounds = array<i64: 1, 1, 256>}, {transform_indices = @transform_2, window_bounds = array<i64: 1, 1, 256>}]} {
    %c0_i32 = arith.constant 0 : i32
    %0 = arith.cmpi eq, %arg2, %c0_i32 : i32
    %1 = arith.extui %0 : i1 to i32
    %c0_i32_0 = arith.constant 0 : i32
    %2 = arith.cmpi ne, %1, %c0_i32_0 : i32
    scf.if %2 {
      %cst_18 = arith.constant 0.000000e+00 : f32
      %24 = vector.broadcast %cst_18 : f32 to vector<1x256xf32>
      %c0_19 = arith.constant 0 : index
      %c0_20 = arith.constant 0 : index
      %c0_21 = arith.constant 0 : index
      %25 = vector.load %arg4[%c0_19, %c0_20, %c0_21] : memref<1x1x256xf32, #tpu.memory_space<vmem>>, vector<1x1x256xf32>
      %26 = vector.shape_cast %25 : vector<1x1x256xf32> to vector<1x256xf32>
      %27 = vector.shape_cast %24 : vector<1x256xf32> to vector<1x1x256xf32>
      tpu.vector_store %arg4[%c0_19, %c0_20, %c0_21], %27 {strides = array<i32>} : memref<1x1x256xf32, #tpu.memory_space<vmem>>, vector<1x1x256xf32>,
      %cst_22 = arith.constant 0xFF800000 : f32
      %28 = vector.broadcast %cst_22 : f32 to vector<1x256xf32>
      %c0_23 = arith.constant 0 : index
      %c0_24 = arith.constant 0 : index
      %c0_25 = arith.constant 0 : index
      %29 = vector.load %arg5[%c0_23, %c0_24, %c0_25] : memref<1x1x256xf32, #tpu.memory_space<vmem>>, vector<1x1x256xf32>
      %30 = vector.shape_cast %29 : vector<1x1x256xf32> to vector<1x256xf32>
      %31 = vector.shape_cast %28 : vector<1x256xf32> to vector<1x1x256xf32>
      tpu.vector_store %arg5[%c0_23, %c0_24, %c0_25], %31 {strides = array<i32>} : memref<1x1x256xf32, #tpu.memory_space<vmem>>, vector<1x1x256xf32>,
    } else {
    }
    %c0 = arith.constant 0 : index
    %c0_1 = arith.constant 0 : index
    %c0_2 = arith.constant 0 : index
    %3 = vector.load %arg4[%c0, %c0_1, %c0_2] : memref<1x1x256xf32, #tpu.memory_space<vmem>>, vector<1x1x256xf32>
    %4 = vector.shape_cast %3 : vector<1x1x256xf32> to vector<1x256xf32>
    %c0_3 = arith.constant 0 : index
    %c0_4 = arith.constant 0 : index
    %c0_5 = arith.constant 0 : index
    %5 = vector.load %arg5[%c0_3, %c0_4, %c0_5] : memref<1x1x256xf32, #tpu.memory_space<vmem>>, vector<1x1x256xf32>
    %6 = vector.shape_cast %5 : vector<1x1x256xf32> to vector<1x256xf32>
    %c0_6 = arith.constant 0 : index
    %c0_7 = arith.constant 0 : index
    %c0_8 = arith.constant 0 : index
    %7 = vector.load %arg3[%c0_6, %c0_7, %c0_8] : memref<1x4x256xf32, #tpu.memory_space<vmem>>, vector<1x4x256xf32>
    %8 = vector.shape_cast %7 : vector<1x4x256xf32> to vector<4x256xf32>
    %cst = arith.constant dense<0.000000e+00> : vector<256xf32>
    %9 = vector.multi_reduction <add>, %8, %cst [0] : vector<4x256xf32> to vector<256xf32>
    %10 = vector.shape_cast %9 : vector<256xf32> to vector<1x256xf32>
    %11 = arith.addf %4, %10 : vector<1x256xf32>
    %cst_9 = arith.constant dense<0xFF800000> : vector<256xf32>
    %12 = vector.multi_reduction <maximumf>, %8, %cst_9 [0] : vector<4x256xf32> to vector<256xf32>
    %13 = vector.shape_cast %12 : vector<256xf32> to vector<1x256xf32>
    %14 = arith.maximumf %6, %13 : vector<1x256xf32>
    %c0_10 = arith.constant 0 : index
    %c0_11 = arith.constant 0 : index
    %c0_12 = arith.constant 0 : index
    %15 = vector.load %arg4[%c0_10, %c0_11, %c0_12] : memref<1x1x256xf32, #tpu.memory_space<vmem>>, vector<1x1x256xf32>
    %16 = vector.shape_cast %15 : vector<1x1x256xf32> to vector<1x256xf32>
    %17 = vector.shape_cast %11 : vector<1x256xf32> to vector<1x1x256xf32>
    tpu.vector_store %arg4[%c0_10, %c0_11, %c0_12], %17 {strides = array<i32>} : memref<1x1x256xf32, #tpu.memory_space<vmem>>, vector<1x1x256xf32>,
    %c0_13 = arith.constant 0 : index
    %c0_14 = arith.constant 0 : index
    %c0_15 = arith.constant 0 : index
    %18 = vector.load %arg5[%c0_13, %c0_14, %c0_15] : memref<1x1x256xf32, #tpu.memory_space<vmem>>, vector<1x1x256xf32>
    %19 = vector.shape_cast %18 : vector<1x1x256xf32> to vector<1x256xf32>
    %20 = vector.shape_cast %14 : vector<1x256xf32> to vector<1x1x256xf32>
    tpu.vector_store %arg5[%c0_13, %c0_14, %c0_15], %20 {strides = array<i32>} : memref<1x1x256xf32, #tpu.memory_space<vmem>>, vector<1x1x256xf32>,
    %c0_i32_16 = arith.constant 0 : i32
    %21 = arith.cmpi eq, %arg2, %c0_i32_16 : i32
    %22 = arith.extui %21 : i1 to i32
    %c0_i32_17 = arith.constant 0 : i32
    %23 = arith.cmpi ne, %22, %c0_i32_17 : i32
    scf.if %23 {
      %c0_18 = arith.constant 0 : index
      %c0_19 = arith.constant 0 : index
      %c0_20 = arith.constant 0 : index
      %24 = vector.load %arg4[%c0_18, %c0_19, %c0_20] : memref<1x1x256xf32, #tpu.memory_space<vmem>>, vector<1x1x256xf32>
      %25 = vector.shape_cast %24 : vector<1x1x256xf32> to vector<1x256xf32>
      %cst_21 = arith.constant 2.500000e-01 : f32
      %26 = vector.broadcast %cst_21 : f32 to vector<1x256xf32>
      %27 = arith.mulf %25, %26 : vector<1x256xf32>
      %c0_22 = arith.constant 0 : index
      %c0_23 = arith.constant 0 : index
      %c0_24 = arith.constant 0 : index
      %28 = vector.load %arg4[%c0_22, %c0_23, %c0_24] : memref<1x1x256xf32, #tpu.memory_space<vmem>>, vector<1x1x256xf32>
      %29 = vector.shape_cast %28 : vector<1x1x256xf32> to vector<1x256xf32>
      %30 = vector.shape_cast %27 : vector<1x256xf32> to vector<1x1x256xf32>
      tpu.vector_store %arg4[%c0_22, %c0_23, %c0_24], %30 {strides = array<i32>} : memref<1x1x256xf32, #tpu.memory_space<vmem>>, vector<1x1x256xf32>,
    } else {
    }
    return
  }
  func.func @transform_0(%arg0: i32, %arg1: i32, %arg2: i32) -> (i32, i32, i32) {
    %c0_i32 = arith.constant 0 : i32
    return %arg0, %arg2, %arg1 : i32, i32, i32
  }
  func.func @transform_1(%arg0: i32, %arg1: i32, %arg2: i32) -> (i32, i32, i32) {
    %c0_i32 = arith.constant 0 : i32
    %c0_i32_0 = arith.constant 0 : i32
    return %arg0, %c0_i32, %arg1 : i32, i32, i32
  }
  func.func @transform_2(%arg0: i32, %arg1: i32, %arg2: i32) -> (i32, i32, i32) {
    %c0_i32 = arith.constant 0 : i32
    %c0_i32_0 = arith.constant 0 : i32
    return %arg0, %c0_i32, %arg1 : i32, i32, i32
  }
}

</mosaic_0001>

<bundles_post_ra>
// kernel: tpu_custom_call.1
= control target key start
LH: loop header
LB: loop body
LE: loop exit
PB: predicated region body
PF: predicated region fallthrough
CT: control target
= control target key end

     0   :  { %8 = vsyncpa [#allocation3], 0  ;;  %s956_s0 = inlined_call_operand.hbm [shape: f32[2,4,256], index: 0, kind: input, shape index: {}]   ;;  %s957_s1 = inlined_call_operand.hbm [shape: f32[2,1,256], index: 1, kind: output, shape index: {0}]   ;;  %s958_s2 = inlined_call_operand.hbm [shape: f32[2,1,256], index: 2, kind: output, shape index: {1}]  }
   0x1   :  { %10 = vsyncpa [#allocation3 + $0x1], 0 }
   0x2   :  { %11 = vsyncpa [#allocation4], 0 }
   0x3   :  { %13 = vsyncpa [#allocation4 + $0x1], 0 }
   0x4   :  { %14 = vsyncpa [#allocation7], 0 }
   0x5   :  { %16 = vsyncpa [#allocation7 + $0x1], 0  ;;  %s722_s9 = smov 0   ;;  %s724_s10 = smov 0  }
   0x6   :  { %s726_s11 = smov 0   ;;  %s728_s12 = smov 0  }
   0x7   :  { %s730_s13 = smov 0   ;;  %s732_s14 = smov 0  }
   0x8 LB: > { %s462_s15 = sadd.s32 4294967295, %s699_s14   ;;  %s463_s16 = sadd.s32 4294967294, %s699_s14   ;;  %s699_s14 = sphi %s732_s14, %s22_s14   ;;  %s695_s13 = sphi %s730_s13, %s976_s13   ;;  %s691_s12 = sphi %s728_s12, %s975_s12   ;;  %s687_s11 = sphi %s726_s11, %s974_s11   ;;  %s683_s10 = sphi %s724_s10, %s973_s10   ;;  %s679_s9 = sphi %s722_s9, %s972_s9  }
   0x9   : > { %s41_s17 = sadd.s32 1, %s695_s13  ;;  %s52_s18 = sadd.s32 1, %s687_s11 }
   0xa   : > { %p43_p0 = scmp.ge.s32.totalorder %s41_s17, 2  ;;  %p59_p1 = scmp.ne.s32.totalorder %s687_s11, %s683_s10 }
   0xb   : > { %p60_p2 = scmp.eq.s32.totalorder %s699_s14, 0  ;;  %p65_p3 = scmp.ne.s32.totalorder %s683_s10, %s679_s9 }
   0xc   : > { %s978_s17 = smov (%p43_p0, %s41_s17), 0  ;;  %p66_p5 = scmp.eq.s32.totalorder %s462_s15, 0 }
   0xd   : > { %p763_p4 = por %p60_p2, %p59_p1  ;;  %s45_s20 = ssub.s32 %s695_s13, %s978_s17 }
   0xe   : > { %p91_p6 = scmp.eq.s32.totalorder %s462_s15, 1  ;;  %p50_p7 = scmp.eq.s32.totalorder %s45_s20, 0 }
   0xf   : > { %p769_p8 = por %p66_p5, %p65_p3  ;;  %p97_p10 = scmp.eq.s32.totalorder %s463_s16, 1 }
  0x10   : > { %p773_p9 = por %p91_p6, %p59_p1  ;;  %p501_p13 = scmp.lt.s32.totalorder %s699_s14, 2 }
  0x11   : > { %s778_s23 = scalar_select %p50_p7, %s687_s11, %s52_s18  }
  0x12   : > { %s962_s22 = scalar_select %p773_p9, 1, 0 }
  0x13   : > { %p780_p11 = por %p97_p10, %p65_p3  ;;  %s145_s25 = sand.u32 1, %s687_s11  }
  0x14   : > { %s466_s26 = sshll.u32 %s145_s25, 3  ;;  %s481_s27 = sshll.u32 %s695_s13, 7 }
  0x15   : > { %s963_s24 = scalar_select %p780_p11, 1, 0 }
  0x16   : > { %s791_s30 = scalar_lea.hbm %s956_s0, %s481_s27  ;;  %s149_s3 = scalar_lea.vmem [#allocation2], %s466_s26 }
  0x17   : > { %s161_s4 = sshll.u32 %s149_s3, 4  ;;  %p797_p0 = pnand %p501_p13, %p763_p4  ;;  %s793_s4 = int_to_ptr.vmem [resolvable:$true] %s161_s4 }
  0x18   : > { %s146_s6 = scalar_lea.sflag [#allocation3], %s145_s25  ;;  %s555_s7 = scalar_lea.hbm %s791_s30, 128 }
  0x19   : > { %p556_p3 = scmp.ne.s32.totalorder %s791_s30, %s555_s7  ;;  %p557_p5 = pneg %p797_p0 }
  0x1a   : > { %s560_s16 = scalar_lea.hbm %s956_s0, 256  ;;  %p561_p4 = scmp.lt.u32.totalorder %s791_s30, %s956_s0 }
  0x1b   : > { %p558_p6 = pnand %p557_p5, %p556_p3  ;;  %p562_p10 = scmp.lt.u32.totalorder %s560_s16, %s555_s7 }
  0x1c   : > { %p564_p12 = scmp.lt.u32.totalorder %s555_s7, %s791_s30 }
  0x1d   : > { %p559_p7 = pneg %p558_p6  ;;  %p563_p13 = por %p562_p10, %p561_p4 }
  0x1f   : > { %p565_p1 = por %p564_p12, %p563_p13 }
  0x21   : > { %p566_p2 = pnand %p565_p1, %p559_p7 }
  0x23   : > { %569 = shalt.err (!%p566_p2)
}
  0x24   : > { %s570_s20 = scalar_lea.vmem %s793_s4, 128  ;;  %s701_s25 = smov [#allocation2]  }
  0x25   : > { %p571_p3 = scmp.ne.s32.totalorder %s793_s4, %s570_s20  ;;  %s575_s26 = sshll.u32 %s701_s25, 4  ;;  %s576_s26 = int_to_ptr.vmem [resolvable:$false] %s575_s26 }
  0x26   : > { %s577_s27 = scalar_lea.vmem %s576_s26, 256  ;;  %p578_p9 = scmp.lt.s32.totalorder %s793_s4, %s576_s26 }
  0x27   : > { %p573_p6 = pnand %p571_p3, %p557_p5  ;;  %p579_p4 = scmp.lt.s32.totalorder %s577_s27, %s570_s20 }
  0x29   : > { %p574_p11 = pneg %p573_p6  ;;  %p580_p10 = por %p579_p4, %p578_p9 }
  0x2b   : > { %p581_p12 = pnand %p580_p10, %p574_p11 }
  0x2d   : > { %584 = shalt.err (!%p581_p12)
}
  0x2e   : > { %493 = dma.hbm_to_vmem [thread:$0]  (!%p797_p0), %s791_s30, 128, %s793_s4, %s146_s6  }
  0x2f   : > { %p965_p1 = scmp.lt.s32.totalorder %s699_s14, 3  ;;  %p966_p2 = scmp.ge.s32.totalorder %s699_s14, 1 }
  0x31   : > { %p167_p5 = pnand %p966_p2, %p965_p1 }
  0x32   : > { %s833_s28 = sand.u32 (!%p167_p5), 1, %s683_s10  }
  0x33   : > { %170 = sbr.rel (%p167_p5) target bundleno = 121 (0x79), region = 24  ;;  %s470_s29 = sshll.u32 (!%p167_p5), %s833_s28, 3 }
  0x34   : > { %s173_s3 = scalar_lea.sflag (!%p167_p5), [#allocation3], %s833_s28  ;;  %s176_s7 = scalar_lea.vmem (!%p167_p5), [#allocation2], %s470_s29 }
  0x3a   : > { %666 = dma.done.wait (%p769_p8), %s173_s3, 128  }
  0x3b   : > { %668 = vsyncadd (%p769_p8), %s173_s3, 4294967168  ;;  %s471_s30 = sshll.u32 %s833_s28, 1  ;;  %v209_v0 = vlaneseq  ;;  %v702_v2 = vmov 0.0   ;;  %v703_v3 = vmov -inf   ;;  %vm221_vm1 = vcmask 1043456   ;;  %v217_v4 = vld [vmem:[%s176_s7] sm:$0xff] }
  0x3c   : > { %s846_s4 = scalar_lea.vmem [#allocation5], %s471_s30  ;;  %s851_s5 = scalar_lea.vmem [#allocation6], %s471_s30  ;;  %v219_v5 = vcombine.high %v217_v4, %v217_v4  ;;  %v255_v6 = vsel %vm221_vm1, %v217_v4, -inf  ;;  %v222_v7 = vsel %vm221_vm1, %v217_v4, 0.0  ;;  %v704_v16 = vmov 1966171168  }
  0x3d   : > { %vm842_vm0 = vcmp.lt.s32.totalorder %v209_v0, 256  ;;  %v256_v8 = vrot.slane %v255_v6, 4  ;;  %v223_v9 = vrot.slane %v222_v7, 4  ;;  %v240_v17 = vunpack.c.l.s4 %v704_v16  ;;  %s482_s21 = sshll.u32 %s691_s12, 5  ;;  %s338_s6 = sshll.u32 %s851_s5, 4  ;;  %s867_s6 = int_to_ptr.vmem [resolvable:$true] %s338_s6 }
  0x3e   : > { %213 = vst.msk [vmem:[%s846_s4] sm:$0x3] %vm842_vm0, %v702_v2  ;;  %214 = vst.msk [vmem:[%s851_s5] sm:$0x3] %vm842_vm0, %v703_v3  ;;  %v262_v10 = vsel %vm221_vm1, %v219_v5, -inf  ;;  %v229_v11 = vsel %vm221_vm1, %v219_v5, 0.0  ;;  %s865_s16 = scalar_lea.hbm %s958_s2, %s482_s21 }
  0x3f   : > { %v257_v12 = vmax.f32 %v255_v6, %v256_v8  ;;  %v263_v13 = vrot.slane %v262_v10, 4  ;;  %v224_v14 = vadd.f32 %v223_v9, %v222_v7  ;;  %v230_v15 = vrot.slane %v229_v11, 4  ;;  %s306_s18 = scalar_lea.sflag [#allocation7], %s833_s28  ;;  %s585_s19 = scalar_lea.vmem %s867_s6, 32 }
  0x40   : > { %v241_v26 = vunpack.c.0.s8 %v240_v17  ;;  %v243_v27 = vshrl.u32 %v209_v0, 7  ;;  %p586_p8 = scmp.ne.s32.totalorder %s867_s6, %s585_s19  ;;  %p969_p9 = scmp.ne.s32.totalorder %s962_s22, 0 }
  0x41   : > { %v258_v18 = vrot.slane %v257_v12, 2  ;;  %v264_v19 = vmax.f32 %v262_v10, %v263_v13  ;;  %v225_v20 = vrot.slane %v224_v14, 2  ;;  %v231_v21 = vadd.f32 %v230_v15, %v229_v11  ;;  %s705_s20 = smov [#allocation6]  }
  0x42   : > { %v244_v36 = vsub.s32 %v241_v26, %v243_v27  ;;  %p587_p11 = pnand %p586_p8, %p969_p9  ;;  %s589_s25 = sshll.u32 %s705_s20, 4  ;;  %s590_s25 = int_to_ptr.vmem [resolvable:$false] %s589_s25 }
  0x43   : > { %v259_v22 = vmax.f32 %v257_v12, %v258_v18  ;;  %v265_v23 = vrot.slane %v264_v19, 2  ;;  %v226_v24 = vadd.f32 %v225_v20, %v224_v14  ;;  %v232_v25 = vrot.slane %v231_v21, 2  ;;  %s591_s26 = scalar_lea.vmem %s590_s25, 64  ;;  %p592_p7 = scmp.lt.s32.totalorder %s867_s6, %s590_s25 }
  0x44   : > { %p588_p0 = pneg %p587_p11  ;;  %p593_p13 = scmp.lt.s32.totalorder %s591_s26, %s585_s19 }
  0x45   : > { %v260_v28 = vrot.slane %v259_v22, 1  ;;  %v266_v29 = vmax.f32 %v264_v19, %v265_v23  ;;  %v227_v30 = vrot.slane %v226_v24, 1  ;;  %v233_v31 = vadd.f32 %v232_v25, %v231_v21  ;;  %v216_v43 = vld [vmem:[%s851_s5] sm:$0x3]  ;;  %v215_v44 = vld [vmem:[%s846_s4] sm:$0x3] }
  0x46   : > { %p594_p3 = por %p593_p13, %p592_p7 }
  0x47   : > { %v261_v32 = vmax.f32 %v259_v22, %v260_v28  ;;  %v267_v33 = vrot.slane %v266_v29, 1  ;;  %v228_v34 = vadd.f32 %v227_v30, %v226_v24  ;;  %v234_v35 = vrot.slane %v233_v31, 1 }
  0x48   : > { %p595_p6 = pnand %p594_p3, %p588_p0 }
  0x49   : > { %v268_v37 = vmax.f32 %v266_v29, %v267_v33  ;;  %v235_v38 = vadd.f32 %v234_v35, %v233_v31 }
  0x4b   : > { %v271_v39 = vcombine.low %v261_v32, %v268_v37  ;;  %v238_v40 = vcombine.low %v228_v34, %v235_v38 }
  0x4d   : > { %v278_v41 = vrot.slane %v271_v39, %v244_v36  ;;  %v245_v42 = vrot.slane %v238_v40, %v244_v36 }
  0x4f   : > { %v285_v45 = vrot.slane %v278_v41, %v244_v36  ;;  %v252_v46 = vrot.slane %v245_v42, %v244_v36 }
  0x51   : > { %v287_v47 = vmax.f32 %v216_v43, %v285_v45  ;;  %v254_v48 = vadd.f32 %v252_v46, %v215_v44 }
  0x53   : > { %293 = vst.msk [vmem:[%s851_s5] sm:$0x3] %vm842_vm0, %v287_v47  ;;  %292 = vst.msk [vmem:[%s846_s4] sm:$0x3] %vm842_vm0, %v254_v48 }
  0x54   : > { %598 = shalt.err (!%p595_p6)
}
  0x55   : > { %s599_s27 = scalar_lea.hbm %s865_s16, 32  ;;  %s603_s7 = scalar_lea.hbm %s958_s2, 64 }
  0x56   : > { %p600_p4 = scmp.ne.s32.totalorder %s865_s16, %s599_s27  ;;  %p604_p1 = scmp.lt.u32.totalorder %s865_s16, %s958_s2 }
  0x57   : > { %p605_p2 = scmp.lt.u32.totalorder %s603_s7, %s599_s27  ;;  %p607_p8 = scmp.lt.u32.totalorder %s599_s27, %s865_s16 }
  0x58   : > { %p601_p10 = pnand %p600_p4, %p969_p9 }
  0x59   : > { %p606_p5 = por %p605_p2, %p604_p1 }
  0x5a   : > { %p602_p12 = pneg %p601_p10 }
  0x5b   : > { %p608_p11 = por %p607_p8, %p606_p5 }
  0x5d   : > { %p609_p0 = pnand %p608_p11, %p602_p12 }
  0x5f   : > { %612 = shalt.err (!%p609_p0)
}
  0x60   : > { %487 = dma.vmem_to_hbm [thread:$0]  (%p969_p9), %s867_s6, 32, %s865_s16, %s306_s18   ;;  %v297_v49 = vld [vmem:[%s846_s4] sm:$0x3] }
  0x61   : > { %s322_s8 = sshll.u32 %s846_s4, 4  ;;  %v298_v50 = vmul.f32 0.25, %v297_v49  ;;  %s904_s20 = scalar_lea.hbm %s957_s1, %s482_s21  ;;  %s906_s8 = int_to_ptr.vmem [resolvable:$true] %s322_s8 }
  0x62   : > { %s301_s25 = scalar_lea.sflag [#allocation4], %s833_s28  ;;  %s613_s26 = scalar_lea.vmem %s906_s8, 32 }
  0x63   : > { %299 = vst.msk [vmem:[%s846_s4] sm:$0x3] %vm842_vm0, %v298_v50  ;;  %p614_p7 = scmp.ne.s32.totalorder %s906_s8, %s613_s26  ;;  %s706_s12 = smov [#allocation5]  }
  0x64   : > { %s617_s6 = sshll.u32 %s706_s12, 4  ;;  %s618_s6 = int_to_ptr.vmem [resolvable:$false] %s617_s6 }
  0x65   : > { %p615_p13 = pnand %p614_p7, %p969_p9  ;;  %s619_s16 = scalar_lea.vmem %s618_s6, 64 }
  0x66   : > { %p620_p6 = scmp.lt.s32.totalorder %s906_s8, %s618_s6  ;;  %p621_p4 = scmp.lt.s32.totalorder %s619_s16, %s613_s26 }
  0x67   : > { %p616_p3 = pneg %p615_p13 }
  0x68   : > { %p622_p10 = por %p621_p4, %p620_p6 }
  0x6a   : > { %p623_p12 = pnand %p622_p10, %p616_p3 }
  0x6c   : > { %626 = shalt.err (!%p623_p12)
}
  0x6d   : > { %s627_s28 = scalar_lea.hbm %s904_s20, 32  ;;  %s631_s18 = scalar_lea.hbm %s957_s1, 64 }
  0x6e   : > { %p628_p1 = scmp.ne.s32.totalorder %s904_s20, %s627_s28  ;;  %p632_p8 = scmp.lt.u32.totalorder %s904_s20, %s957_s1 }
  0x6f   : > { %p633_p11 = scmp.lt.u32.totalorder %s631_s18, %s627_s28  ;;  %p635_p7 = scmp.lt.u32.totalorder %s627_s28, %s904_s20 }
  0x70   : > { %p629_p2 = pnand %p628_p1, %p969_p9 }
  0x71   : > { %p634_p0 = por %p633_p11, %p632_p8 }
  0x72   : > { %p630_p5 = pneg %p629_p2 }
  0x73   : > { %p636_p13 = por %p635_p7, %p634_p0 }
  0x75   : > { %p637_p3 = pnand %p636_p13, %p630_p5 }
  0x77   : > { %640 = shalt.err (!%p637_p3)
}
  0x78   : > { %486 = dma.vmem_to_hbm [thread:$0]  (%p969_p9), %s906_s8, 32, %s904_s20, %s301_s25  }
  0x79 PF: > { %s350_s3 = sand.u32 1, %s679_s9   ;;  %p970_p6 = scmp.ne.s32.totalorder %s963_s24, 0 }
  0x7a   : > { %p971_p4 = scmp.ge.s32.totalorder %s699_s14, 2  ;;  %s351_s7 = scalar_lea.sflag [#allocation4], %s350_s3 }
  0x7c   : > { %p495_p10 = pnand %p971_p4, %p970_p6 }
  0x7e   : > { %670 = dma.done.wait (!%p495_p10), %s351_s7, 32  }
  0x7f   : > { %672 = vsyncadd (!%p495_p10), %s351_s7, 4294967264  ;;  %s360_s30 = scalar_lea.sflag [#allocation7], %s350_s3 }
  0x80   : > { %674 = dma.done.wait (!%p495_p10), %s360_s30, 32  }
  0x81   : > { %676 = vsyncadd (!%p495_p10), %s360_s30, 4294967264  ;;  %s22_s14 = sadd.s32 1, %s699_s14   ;;  %s972_s9 = smov %s683_s10 }
  0x82   : > { %p19_p12 = scmp.ge.s32.totalorder %s22_s14, 4   ;;  %s973_s10 = smov %s687_s11 }
  0x83   : > { %s974_s11 = smov %s778_s23  ;;  %s975_s12 = smov %s695_s13 }
  0x84   : > { %s976_s13 = smov %s978_s17  ;;  %21 = sbr.rel (!%p19_p12) target bundleno = 8 (0x8), region = 94 }
  0x8b   :  { %365 = vsyncpa [#allocation3], 1 }
  0x8c   :  { %367 = vsyncpa [#allocation3 + $0x1], 1 }
  0x8d   :  { %368 = vsyncpa [#allocation4], 1 }
  0x8e   :  { %370 = vsyncpa [#allocation4 + $0x1], 1 }
  0x8f   :  { %371 = vsyncpa [#allocation7], 1 }
  0x90   :  { %373 = vsyncpa [#allocation7 + $0x1], 1 }

</bundles_post_ra>
